<compile_context>
chip_gen: v7x
topology: tpu7x:2x2x1
jax: 0.10.0
libtpu: 0.0.40
codegen_flags: <defaults>
</compile_context>

<pallas_src>
import functools
import math

import jax
import jax.numpy as jnp
from jax import lax
from jax.experimental import pallas as pl
from jax.experimental.pallas import tpu as pltpu

N_EMBD = 256        # matches `n_embd` in model.py
BLOCK_SIZE = 1000   # `block_size` in model.py (tril replaced by iota mask)
DROPOUT = 0.0       # dropout prob is 0.0 -> identity, omitted

_LANE = 128         # TPU lane width; all sequence tiles are 128-aligned


def _round_up(n, m):
    return ((n + m - 1) // m) * m


# --------------------------- Stage 1: fused QKV projection ---------------------------
def _qkv_proj_kernel(x_ref, w_ref, q_ref, k_ref, v_ref):
    # x_ref : (1, T_pad, C) f32   full (padded) sequence for this batch element
    # w_ref : (C, 3H)       bf16  fused [query * C**-0.5 | key | value] weights (resident)
    # q_ref : (1, T_pad, H) bf16  pre-scaled Q
    # k_ref : (1, T_pad, H) bf16  K (transposed to (H, T_pad) by the wrapper afterwards)
    # v_ref : (1, T_pad, H) bf16  V
    h = q_ref.shape[2]
    x_bf = x_ref[0].astype(jnp.bfloat16)                                     # (T_pad, C)
    qkv = jnp.dot(x_bf, w_ref[...], preferred_element_type=jnp.float32)      # (T_pad, 3H)
    q_ref[0] = qkv[:, :h].astype(jnp.bfloat16)
    k_ref[0] = qkv[:, h:2 * h].astype(jnp.bfloat16)
    v_ref[0] = qkv[:, 2 * h:].astype(jnp.bfloat16)


# --------------------------- Stage 2: flash causal attention ---------------------------
def _flash_kernel(q_ref, kT_ref, v_ref, o_ref, *, tk):
    # q_ref : (1, TQ, H)     bf16  pre-scaled query tile (rows [qi*TQ, qi*TQ+TQ))
    # kT_ref: (1, H, T_pad)  bf16  keys, pre-transposed (resident across q-tiles)
    # v_ref : (1, T_pad, H)  bf16  values (resident across q-tiles)
    # o_ref : (1, TQ, H)     f32   output tile
    qi = pl.program_id(1)
    tq, h = q_ref.shape[1], q_ref.shape[2]

    q = q_ref[0]                    # (TQ, H) bf16
    kT_b = kT_ref.at[0]             # (H, T_pad) ref view
    v_b = v_ref.at[0]               # (T_pad, H) ref view

    q_start = qi * tq
    j_diag = q_start // tk          # K-chunk containing the causal diagonal

    def attend(j, m, l, acc, masked):
        c0 = pl.multiple_of(j * tk, tk)
        kT_blk = kT_b[:, pl.ds(c0, tk)]                                      # (H, TK) bf16
        v_blk = v_b[pl.ds(c0, tk), :]                                        # (TK, H) bf16
        s = jnp.dot(q, kT_blk, preferred_element_type=jnp.float32)           # (TQ, TK) f32
        if masked:  # only the diagonal chunk needs the causal mask (global indices)
            row = q_start + lax.broadcasted_iota(jnp.int32, (tq, tk), 0)
            col = c0 + lax.broadcasted_iota(jnp.int32, (tq, tk), 1)
            s = jnp.where(col <= row, s, -jnp.inf)
        m_new = jnp.maximum(m, s.max(axis=-1, keepdims=True))
        alpha = jnp.exp(m - m_new)
        p = jnp.exp(s - m_new)
        l_new = alpha * l + p.sum(axis=-1, keepdims=True)
        acc_new = alpha * acc + jnp.dot(p.astype(jnp.bfloat16), v_blk,
                                        preferred_element_type=jnp.float32)
        return m_new, l_new, acc_new

    # Online-softmax state carried in registers (no VMEM scratch round-trips).
    m0 = jnp.full((tq, 1), -jnp.inf, dtype=jnp.float32)
    l0 = jnp.zeros((tq, 1), dtype=jnp.float32)
    acc0 = jnp.zeros((tq, h), dtype=jnp.float32)

    def body(j, carry):
        m, l, acc = carry
        return attend(j, m, l, acc, masked=False)

    # strictly-below-diagonal chunks (fully visible, unmasked)
    m, l, acc = lax.fori_loop(0, j_diag, body, (m0, l0, acc0))
    # diagonal chunk (causal iota mask); above-diagonal chunks are skipped entirely
    m, l, acc = attend(j_diag, m, l, acc, masked=True)

    # dropout(p=0.0) is the identity -> skipped
    o_ref[0] = (acc * pl.reciprocal(l, approx=True)).astype(o_ref.dtype)


# --------------------------- wrapper ---------------------------
def head_forward(x, w_key, w_query, w_value, *, max_k_chunk=512):
    """Pallas forward of `Head`.

    x:        (B, T, C) float32
    w_*:      (C, H)    float32  (transposed relative to nn.Linear.weight)
    returns:  (B, T, H) float32
    """
    B, T, C = x.shape
    H = w_key.shape[1]
    assert T <= BLOCK_SIZE

    # 128-aligned sequence tiling.
    T_pad = _round_up(T, _LANE)
    tq = _LANE
    tk = _LANE
    for cand in (512, 384, 256, 128):
        if cand <= max_k_chunk and cand <= T_pad and T_pad % cand == 0:
            tk = cand
            break
    nq = T_pad // tq

    if T_pad != T:
        x = jnp.pad(x, ((0, 0), (0, T_pad - T), (0, 0)))

    # Fuse the three projections; fold the softmax scale (C**-0.5 = 1/16, exact
    # in bf16) into the query weights.  NOTE: scale uses C = n_embd, matching
    # the PyTorch module (not head_size**-0.5).
    scale = C ** (-0.5)
    w_qkv = jnp.concatenate([w_query * scale, w_key, w_value], axis=1).astype(jnp.bfloat16)

    # ---- Stage 1: fused QKV projection (Pallas) ----
    q, k, v = pl.pallas_call(
        _qkv_proj_kernel,
        out_shape=(jax.ShapeDtypeStruct((B, T_pad, H), jnp.bfloat16),
                   jax.ShapeDtypeStruct((B, T_pad, H), jnp.bfloat16),
                   jax.ShapeDtypeStruct((B, T_pad, H), jnp.bfloat16)),
        grid_spec=pltpu.PrefetchScalarGridSpec(
            num_scalar_prefetch=0,
            grid=(B,),
            in_specs=[
                pl.BlockSpec((1, T_pad, C), lambda b: (b, 0, 0)),
                pl.BlockSpec((C, 3 * H), lambda b: (0, 0)),
            ],
            out_specs=(pl.BlockSpec((1, T_pad, H), lambda b: (b, 0, 0)),
                       pl.BlockSpec((1, T_pad, H), lambda b: (b, 0, 0)),
                       pl.BlockSpec((1, T_pad, H), lambda b: (b, 0, 0))),
        ),
        compiler_params=pltpu.CompilerParams(
            dimension_semantics=("parallel",),
        ),
    )(x, w_qkv)

    # One-time K layout change (tiny bf16 slab) so the flash kernel's score
    # matmul is a plain (TQ,H)@(H,TK) with no per-tile relayout/transpose.
    kT = jnp.swapaxes(k, 1, 2)                                   # (B, H, T_pad)

    # ---- Stage 2: flash-style causal attention (Pallas) ----
    out_pad = pl.pallas_call(
        functools.partial(_flash_kernel, tk=tk),
        out_shape=jax.ShapeDtypeStruct((B, T_pad, H), x.dtype),
        grid_spec=pltpu.PrefetchScalarGridSpec(
            num_scalar_prefetch=0,
            grid=(B, nq),
            in_specs=[
                pl.BlockSpec((1, tq, H), lambda b, i: (b, i, 0)),
                # K^T / V: full sequence per batch element, resident across q-tiles
                pl.BlockSpec((1, H, T_pad), lambda b, i: (b, 0, 0)),
                pl.BlockSpec((1, T_pad, H), lambda b, i: (b, 0, 0)),
            ],
            out_specs=pl.BlockSpec((1, tq, H), lambda b, i: (b, i, 0)),
        ),
        compiler_params=pltpu.CompilerParams(
            # No cross-grid-step state: both axes are safe to shard across cores.
            dimension_semantics=("parallel", "parallel"),
        ),
    )(q, kT, v)

    return out_pad[:, :T, :]


def _reference(x, w_key, w_query, w_value):
    """Pure-JAX f32 reference matching the PyTorch forward exactly."""
    B, T, C = x.shape
    k = x @ w_key
    q = x @ w_query
    v = x @ w_value
    wei = (q @ jnp.swapaxes(k, -2, -1)) * (C ** -0.5)
    mask = jnp.tril(jnp.ones((T, T), dtype=bool))
    wei = jnp.where(mask, wei, -jnp.inf)
    wei = jax.nn.softmax(wei, axis=-1)
    return wei @ v


if __name__ == "__main__":
    C, HEAD_SIZE = N_EMBD, 32
    key = jax.random.PRNGKey(0)
    kx, kk, kq, kv, kx2 = jax.random.split(key, 5)

    # nn.Linear(n_embd, head_size, bias=False)-style init, stored as (C, head_size).
    bound = 1.0 / math.sqrt(C)
    w_key = jax.random.uniform(kk, (C, HEAD_SIZE), jnp.float32, -bound, bound)
    w_query = jax.random.uniform(kq, (C, HEAD_SIZE), jnp.float32, -bound, bound)
    w_value = jax.random.uniform(kv, (C, HEAD_SIZE), jnp.float32, -bound, bound)

    # Case 1: small sequence (B=2, T=8) -> single 128-padded tile, diagonal-chunk path.
    x1 = jax.random.normal(kx, (2, 8, C), dtype=jnp.float32)
    out1 = jax.block_until_ready(head_forward(x1, w_key, w_query, w_value))
    ref1 = _reference(x1, w_key, w_query, w_value)
    assert out1.shape == (2, 8, HEAD_SIZE)
    assert jnp.allclose(out1, ref1, atol=2e-2, rtol=2e-2)

    # Case 2: multi-tile causal path (B=2, T=200 -> T_pad=256, TQ=TK=128):
    # exercises padding, the unmasked off-diagonal fori_loop chunk and the
    # masked diagonal chunk.
    x2 = jax.random.normal(kx2, (2, 200, C), dtype=jnp.float32)
    out2 = jax.block_until_ready(head_forward(x2, w_key, w_query, w_value, max_k_chunk=128))
    ref2 = _reference(x2, w_key, w_query, w_value)
    assert out2.shape == (2, 200, HEAD_SIZE)
    assert jnp.allclose(out2, ref2, atol=2e-2, rtol=2e-2)

    print("KERNEL_OK")
</pallas_src>

<mosaic_0001>
module attributes {stable_mosaic.version = 11 : i64} {
  func.func @_qkv_proj_kernel(%arg0: i32, %arg1: memref<1x128x256xf32, #tpu.memory_space<vmem>>, %arg2: memref<256x96xbf16, #tpu.memory_space<vmem>>, %arg3: memref<1x128x32xbf16, #tpu.memory_space<vmem>>, %arg4: memref<1x128x32xbf16, #tpu.memory_space<vmem>>, %arg5: memref<1x128x32xbf16, #tpu.memory_space<vmem>>) attributes {dimension_semantics = [#tpu.dimension_semantics<parallel>], iteration_bounds = array<i64: 2>, scalar_prefetch = 0 : i64, scratch_operands = 0 : i64, tpu.core_type = #tpu.core_type<tc>, window_params = [{transform_indices = @transform_0, window_bounds = array<i64: 1, 128, 256>}, {pipeline_mode = #tpu.pipeline_mode<synchronous>, transform_indices = @transform_1, window_bounds = array<i64: 256, 96>}, {transform_indices = @transform_2, window_bounds = array<i64: 1, 128, 32>}, {transform_indices = @transform_3, window_bounds = array<i64: 1, 128, 32>}, {transform_indices = @transform_4, window_bounds = array<i64: 1, 128, 32>}]} {
    %c0 = arith.constant 0 : index
    %c0_0 = arith.constant 0 : index
    %c0_1 = arith.constant 0 : index
    %0 = vector.load %arg1[%c0, %c0_0, %c0_1] : memref<1x128x256xf32, #tpu.memory_space<vmem>>, vector<1x128x256xf32>
    %1 = vector.shape_cast %0 : vector<1x128x256xf32> to vector<128x256xf32>
    %2 = arith.truncf %1 : vector<128x256xf32> to vector<128x256xbf16>
    %c0_2 = arith.constant 0 : index
    %c0_3 = arith.constant 0 : index
    %3 = vector.load %arg2[%c0_2, %c0_3] : memref<256x96xbf16, #tpu.memory_space<vmem>>, vector<256x96xbf16>
    %cst = arith.constant dense<0.000000e+00> : vector<128x96xf32>
    %4 = tpu.matmul %2, %3, %cst {dimension_numbers = #tpu.dot_dimension_numbers<[1], [0], [0], [1], [0, 0, 1, 1], [], []>} : vector<128x256xbf16>, vector<256x96xbf16>, vector<128x96xf32> -> vector<128x96xf32>
    %5 = vector.extract_strided_slice %4 {offsets = [0, 0], sizes = [128, 32], strides = [1, 1]} : vector<128x96xf32> to vector<128x32xf32>
    %6 = arith.truncf %5 : vector<128x32xf32> to vector<128x32xbf16>
    %c0_4 = arith.constant 0 : index
    %c0_5 = arith.constant 0 : index
    %c0_6 = arith.constant 0 : index
    %7 = vector.load %arg3[%c0_4, %c0_5, %c0_6] : memref<1x128x32xbf16, #tpu.memory_space<vmem>>, vector<1x128x32xbf16>
    %8 = vector.shape_cast %7 : vector<1x128x32xbf16> to vector<128x32xbf16>
    %9 = vector.shape_cast %6 : vector<128x32xbf16> to vector<1x128x32xbf16>
    tpu.vector_store %arg3[%c0_4, %c0_5, %c0_6], %9 {strides = array<i32>} : memref<1x128x32xbf16, #tpu.memory_space<vmem>>, vector<1x128x32xbf16>,
    %10 = vector.extract_strided_slice %4 {offsets = [0, 32], sizes = [128, 32], strides = [1, 1]} : vector<128x96xf32> to vector<128x32xf32>
    %11 = arith.truncf %10 : vector<128x32xf32> to vector<128x32xbf16>
    %c0_7 = arith.constant 0 : index
    %c0_8 = arith.constant 0 : index
    %c0_9 = arith.constant 0 : index
    %12 = vector.load %arg4[%c0_7, %c0_8, %c0_9] : memref<1x128x32xbf16, #tpu.memory_space<vmem>>, vector<1x128x32xbf16>
    %13 = vector.shape_cast %12 : vector<1x128x32xbf16> to vector<128x32xbf16>
    %14 = vector.shape_cast %11 : vector<128x32xbf16> to vector<1x128x32xbf16>
    tpu.vector_store %arg4[%c0_7, %c0_8, %c0_9], %14 {strides = array<i32>} : memref<1x128x32xbf16, #tpu.memory_space<vmem>>, vector<1x128x32xbf16>,
    %15 = vector.extract_strided_slice %4 {offsets = [0, 64], sizes = [128, 32], strides = [1, 1]} : vector<128x96xf32> to vector<128x32xf32>
    %16 = arith.truncf %15 : vector<128x32xf32> to vector<128x32xbf16>
    %c0_10 = arith.constant 0 : index
    %c0_11 = arith.constant 0 : index
    %c0_12 = arith.constant 0 : index
    %17 = vector.load %arg5[%c0_10, %c0_11, %c0_12] : memref<1x128x32xbf16, #tpu.memory_space<vmem>>, vector<1x128x32xbf16>
    %18 = vector.shape_cast %17 : vector<1x128x32xbf16> to vector<128x32xbf16>
    %19 = vector.shape_cast %16 : vector<128x32xbf16> to vector<1x128x32xbf16>
    tpu.vector_store %arg5[%c0_10, %c0_11, %c0_12], %19 {strides = array<i32>} : memref<1x128x32xbf16, #tpu.memory_space<vmem>>, vector<1x128x32xbf16>,
    return
  }
  func.func @transform_0(%arg0: i32) -> (i32, i32, i32) {
    %c0_i32 = arith.constant 0 : i32
    %c0_i32_0 = arith.constant 0 : i32
    %c0_i32_1 = arith.constant 0 : i32
    return %arg0, %c0_i32, %c0_i32_0 : i32, i32, i32
  }
  func.func @transform_1(%arg0: i32) -> (i32, i32) {
    %c0_i32 = arith.constant 0 : i32
    %c0_i32_0 = arith.constant 0 : i32
    %c0_i32_1 = arith.constant 0 : i32
    return %c0_i32, %c0_i32_0 : i32, i32
  }
  func.func @transform_2(%arg0: i32) -> (i32, i32, i32) {
    %c0_i32 = arith.constant 0 : i32
    %c0_i32_0 = arith.constant 0 : i32
    %c0_i32_1 = arith.constant 0 : i32
    return %arg0, %c0_i32, %c0_i32_0 : i32, i32, i32
  }
  func.func @transform_3(%arg0: i32) -> (i32, i32, i32) {
    %c0_i32 = arith.constant 0 : i32
    %c0_i32_0 = arith.constant 0 : i32
    %c0_i32_1 = arith.constant 0 : i32
    return %arg0, %c0_i32, %c0_i32_0 : i32, i32, i32
  }
  func.func @transform_4(%arg0: i32) -> (i32, i32, i32) {
    %c0_i32 = arith.constant 0 : i32
    %c0_i32_0 = arith.constant 0 : i32
    %c0_i32_1 = arith.constant 0 : i32
    return %arg0, %c0_i32, %c0_i32_0 : i32, i32, i32
  }
}

</mosaic_0001>

<bundles_post_ra>
// kernel: tpu_custom_call.1
= control target key start
LH: loop header
LB: loop body
LE: loop exit
PB: predicated region body
PF: predicated region fallthrough
CT: control target
= control target key end

     0   :  { %10 = vsyncpa [#allocation3], 0  ;;  %s1497_s0 = inlined_call_operand.hbm [shape: f32[2,128,256], index: 0, kind: input, shape index: {}]   ;;  %s1498_s1 = inlined_call_operand.vmem [shape: bf16[256,96], index: 1, kind: input, shape index: {}]   ;;  %s1499_s2 = inlined_call_operand.vmem [shape: bf16[2,128,32], index: 2, kind: output, shape index: {0}]   ;;  %s1500_s3 = inlined_call_operand.vmem [shape: bf16[2,128,32], index: 3, kind: output, shape index: {1}]   ;;  %s1501_s4 = inlined_call_operand.vmem [shape: bf16[2,128,32], index: 4, kind: output, shape index: {2}]  }
   0x1   :  { %12 = vsyncpa [#allocation3 + $0x1], 0  ;;  %s1162_s15 = smov 0   ;;  %s1164_s16 = smov 0  }
   0x2   :  { %s1166_s17 = smov 0   ;;  %s1168_s18 = smov 0  }
   0x3 LB: > { %s1181_s19 = sadd.s32 4294967295, %s1130_s18   ;;  %s1184_s20 = sadd.s32 1, %s1130_s18   ;;  %s1130_s18 = sphi %s1168_s18, %s1508_s18   ;;  %s1126_s17 = sphi %s1166_s17, %s1507_s17   ;;  %s1122_s16 = sphi %s1164_s16, %s1506_s16   ;;  %s1118_s15 = sphi %s1162_s15, %s1505_s15  }
   0x4   : > { %s22_s21 = ssub.s32 %s1130_s18, %s1184_s20  ;;  %s25_s22 = sadd.s32 1, %s1126_s17 }
   0x5   : > { %p23_p0 = scmp.eq.s32.totalorder %s22_s21, 0  ;;  %p32_p1 = scmp.ne.s32.totalorder %s1126_s17, %s1122_s16 }
   0x6   : > { %p33_p2 = scmp.eq.s32.totalorder %s1130_s18, 0  ;;  %p38_p3 = scmp.ne.s32.totalorder %s1122_s16, %s1118_s15 }
   0x7   : > { %s1194_s23 = scalar_select %p23_p0, %s1126_s17, %s25_s22  }
   0x8   : > { %p34_p4 = por %p33_p2, %p32_p1  ;;  %p39_p5 = scmp.eq.s32.totalorder %s1181_s19, 0 }
   0x9   : > { %p1013_p6 = scmp.lt.s32.totalorder %s1130_s18, 2  ;;  %s164_s25 = sand.u32 1, %s1126_s17  }
   0xa   : > { %p1198_p7 = por %p39_p5, %p38_p3  ;;  %s862_s26 = sshll.u32 %s164_s25, 8 }
   0xb   : > { %s907_s27 = sshll.u32 %s1130_s18, 12  ;;  %s168_s5 = scalar_lea.vmem [#allocation2], %s862_s26 }
   0xc   : > { %s1207_s30 = scalar_lea.hbm %s1497_s0, %s907_s27  ;;  %s175_s6 = sshll.u32 %s168_s5, 4  ;;  %s1209_s6 = int_to_ptr.vmem [resolvable:$true] %s175_s6 }
   0xd   : > { %p1211_p8 = pnand %p1013_p6, %p34_p4  ;;  %s1216_s8 = scalar_lea.sflag [#allocation3], %s164_s25 }
   0xe   : > { %s1066_s9 = scalar_lea.hbm %s1207_s30, 4096  ;;  %s1071_s12 = scalar_lea.hbm %s1497_s0, 8192 }
   0xf   : > { %p1067_p10 = scmp.ne.s32.totalorder %s1207_s30, %s1066_s9  ;;  %p1068_p11 = pneg %p1211_p8 }
  0x10   : > { %p1072_p0 = scmp.lt.u32.totalorder %s1207_s30, %s1497_s0  ;;  %p1073_p1 = scmp.lt.u32.totalorder %s1071_s12, %s1066_s9 }
  0x11   : > { %p1069_p12 = pnand %p1068_p11, %p1067_p10  ;;  %p1075_p3 = scmp.lt.u32.totalorder %s1066_s9, %s1207_s30 }
  0x12   : > { %p1074_p2 = por %p1073_p1, %p1072_p0 }
  0x13   : > { %p1070_p13 = pneg %p1069_p12 }
  0x14   : > { %p1076_p4 = por %p1075_p3, %p1074_p2 }
  0x16   : > { %p1077_p5 = pnand %p1076_p4, %p1070_p13 }
  0x18   : > { %1080 = shalt.err (!%p1077_p5)
}
  0x19   : > { %s1081_s15 = scalar_lea.vmem %s1209_s6, 4096  ;;  %s1132_s21 = smov [#allocation2]  }
  0x1a   : > { %p1082_p6 = scmp.ne.s32.totalorder %s1209_s6, %s1081_s15  ;;  %s1086_s22 = sshll.u32 %s1132_s21, 4  ;;  %s1087_s22 = int_to_ptr.vmem [resolvable:$false] %s1086_s22 }
  0x1b   : > { %s1088_s25 = scalar_lea.vmem %s1087_s22, 8192  ;;  %p1089_p9 = scmp.lt.s32.totalorder %s1209_s6, %s1087_s22 }
  0x1c   : > { %p1084_p10 = pnand %p1082_p6, %p1068_p11  ;;  %p1090_p0 = scmp.lt.s32.totalorder %s1088_s25, %s1081_s15 }
  0x1e   : > { %p1085_p12 = pneg %p1084_p10  ;;  %p1091_p1 = por %p1090_p0, %p1089_p9 }
  0x20   : > { %p1092_p2 = pnand %p1091_p1, %p1085_p12 }
  0x22   : > { %1095 = shalt.err (!%p1092_p2)
}
  0x23   : > { %s1133_s26 = smov 256   ;;  %s1134_s27 = smov 16  }
  0x24   : > { %1012 = dma.hbm_to_vmem [thread:$0]  (!%p1211_p8), %s1207_s30, 4096, %s1209_s6, %s1216_s8, %s1133_s26, %s1133_s26, %s1134_s27  }
  0x25   : > { %p183_p11 = scmp.lt.s32.totalorder %s1130_s18, 3  ;;  %p1504_p13 = scmp.ge.s32.totalorder %s1130_s18, 1 }
  0x27   : > { %p184_p3 = pnand %p1504_p13, %p183_p11 }
  0x28   : > { %s189_s28 = sand.u32 (!%p184_p3), 1, %s1122_s16  }
  0x29   : > { %187 = sbr.rel (%p184_p3) target bundleno = 477 (0x1dd), region = 28  ;;  %s866_s29 = sshll.u32 (!%p184_p3), %s189_s28, 8 }
  0x2a   : > { %s190_s5 = scalar_lea.sflag (!%p184_p3), [#allocation3], %s189_s28  ;;  %s1248_s9 = scalar_lea.vmem (!%p184_p3), [#allocation2], %s866_s29 }
  0x30   : > { %1113 = dma.done.wait (%p1198_p7), %s190_s5, 4096  }
  0x31   : > { %1115 = vsyncadd (%p1198_p7), %s190_s5, 4294963200  ;;  %v1050_v0 = vld [vmem:[%s1498_s1 + $0x40] sm:$0xff]   ;;  %v1052_v2 = vld [vmem:[%s1498_s1 + $0x48] sm:$0xff]   ;;  %p228_p7 = scmp.lt.s32.totalorder %s1181_s19, 1  ;;  %vm581_vm0 = vcmask 257024   ;;  %s1136_s26 = smov 64  }
  0x32   : > { %v1051_v1 = vld [vmem:[%s1498_s1] sm:$0xff]   ;;  %927 = vmatprep.subr.bf16.mxu0 %v1050_v0  ;;  %991 = vmatprep.subr.bf16.mxu1 %v1050_v0  ;;  %v1053_v3 = vld [vmem:[%s1498_s1 + $0x8] sm:$0xff]   ;;  %v1054_v4 = vld [vmem:[%s1498_s1 + $0x50] sm:$0xff]  }
  0x33   : > { %928 = vmatpush3.bf16.msra.mxu0 %v1051_v1  ;;  %999 = vmatpush3.bf16.msra.mxu1 %v1051_v1  ;;  %v1055_v5 = vld [vmem:[%s1498_s1 + $0x10] sm:$0xff]   ;;  %v1056_v6 = vld [vmem:[%s1498_s1 + $0x58] sm:$0xff]   ;;  %v1058_v8 = vld [vmem:[%s1498_s1 + $0x60] sm:$0xff]   ;;  %s1510_s19 = smov (!%p228_p7, %s1181_s19), 1 }
  0x34   : > { %929 = vmatprep.subr.bf16.mxu0 %v1052_v2  ;;  %992 = vmatprep.subr.bf16.mxu1 %v1052_v2  ;;  %v1057_v7 = vld [vmem:[%s1498_s1 + $0x18] sm:$0xff]   ;;  %v1059_v9 = vld [vmem:[%s1498_s1 + $0x20] sm:$0xff]   ;;  %v1060_v10 = vld [vmem:[%s1498_s1 + $0x68] sm:$0xff]   ;;  %s1336_s21 = sshll.u32 %s1510_s19, 6  ;;  %s1135_s19 = smov 96  }
  0x35   : > { %v245_v11 = vld [vmem:[%s1248_s9 + $0x8] sm:$0xff]  ;;  %v247_v12 = vld [vmem:[%s1248_s9 + $0x18] sm:$0xff]  ;;  %v1062_v18 = vld [vmem:[%s1498_s1 + $0x70] sm:$0xff]   ;;  %s1412_s29 = scalar_lea.vmem %s1500_s3, %s1336_s21  ;;  %s1422_s11 = scalar_lea.vmem %s1501_s4, %s1336_s21 }
  0x36   : > { %v261_v13 = vld [vmem:[%s1248_s9 + $0x88] sm:$0xff]  ;;  %v277_v14 = vpack.c.bf16 %v247_v12, %v245_v11  ;;  %v263_v15 = vld [vmem:[%s1248_s9 + $0x98] sm:$0xff]  ;;  %v1063_v19 = vld [vmem:[%s1498_s1 + $0x30] sm:$0xff]  }
  0x37   : > { %930 = vmatpush3.bf16.msra.mxu0 %v1053_v3  ;;  %1000 = vmatpush3.bf16.msra.mxu1 %v1053_v3  ;;  %v285_v16 = vpack.c.bf16 %v263_v15, %v261_v13  ;;  %v1061_v17 = vld [vmem:[%s1498_s1 + $0x28] sm:$0xff]   ;;  %v1064_v20 = vld [vmem:[%s1498_s1 + $0x78] sm:$0xff]   ;;  %v244_v22 = vld [vmem:[%s1248_s9] sm:$0xff] }
  0x38   : > { %931 = vmatprep.subr.bf16.mxu0 %v1054_v4  ;;  %993 = vmatprep.subr.bf16.mxu1 %v1054_v4  ;;  %v1065_v21 = vld [vmem:[%s1498_s1 + $0x38] sm:$0xff]   ;;  %v246_v23 = vld [vmem:[%s1248_s9 + $0x10] sm:$0xff]  ;;  %v260_v24 = vld [vmem:[%s1248_s9 + $0x80] sm:$0xff] }
  0x39   : > { %452 = vmatprep.mubr.bf16.mxu0 %v277_v14  ;;  %484 = vmatprep.mubr.bf16.mxu1 %v285_v16  ;;  %v262_v25 = vld [vmem:[%s1248_s9 + $0x90] sm:$0xff]  ;;  %v249_v26 = vld [vmem:[%s1248_s9 + $0x28] sm:$0xff]  ;;  %v251_v27 = vld [vmem:[%s1248_s9 + $0x38] sm:$0xff]  ;;  %v276_v30 = vpack.c.bf16 %v246_v23, %v244_v22 }
  0x3a   : > { %v265_v28 = vld [vmem:[%s1248_s9 + $0xa8] sm:$0xff]  ;;  %v267_v29 = vld [vmem:[%s1248_s9 + $0xb8] sm:$0xff]  ;;  %v284_v31 = vpack.c.bf16 %v262_v25, %v260_v24  ;;  %v279_v32 = vpack.c.bf16 %v251_v27, %v249_v26  ;;  %v248_v34 = vld [vmem:[%s1248_s9 + $0x20] sm:$0xff] }
  0x3b   : > { %932 = vmatpush3.bf16.msra.mxu0 %v1055_v5  ;;  %1001 = vmatpush3.bf16.msra.mxu1 %v1055_v5  ;;  %v287_v33 = vpack.c.bf16 %v267_v29, %v265_v28  ;;  %v250_v35 = vld [vmem:[%s1248_s9 + $0x30] sm:$0xff]  ;;  %v264_v36 = vld [vmem:[%s1248_s9 + $0xa0] sm:$0xff]  ;;  %v253_v38 = vld [vmem:[%s1248_s9 + $0x48] sm:$0xff] }
  0x3c   : > { %933 = vmatprep.subr.bf16.mxu0 %v1056_v6  ;;  %994 = vmatprep.subr.bf16.mxu1 %v1056_v6  ;;  %v266_v37 = vld [vmem:[%s1248_s9 + $0xb0] sm:$0xff]  ;;  %v255_v39 = vld [vmem:[%s1248_s9 + $0x58] sm:$0xff]  ;;  %v269_v40 = vld [vmem:[%s1248_s9 + $0xc8] sm:$0xff]  ;;  %v278_v42 = vpack.c.bf16 %v250_v35, %v248_v34 }
  0x3d   : > { %v271_v41 = vld [vmem:[%s1248_s9 + $0xd8] sm:$0xff]  ;;  %v286_v43 = vpack.c.bf16 %v266_v37, %v264_v36  ;;  %v281_v44 = vpack.c.bf16 %v255_v39, %v253_v38  ;;  %v252_v46 = vld [vmem:[%s1248_s9 + $0x40] sm:$0xff]  ;;  %v254_v47 = vld [vmem:[%s1248_s9 + $0x50] sm:$0xff] }
  0x3e   : > { %v289_v45 = vpack.c.bf16 %v271_v41, %v269_v40  ;;  %v268_v48 = vld [vmem:[%s1248_s9 + $0xc0] sm:$0xff]  ;;  %v270_v49 = vld [vmem:[%s1248_s9 + $0xd0] sm:$0xff]  ;;  %v257_v50 = vld [vmem:[%s1248_s9 + $0x68] sm:$0xff]  ;;  %v280_v54 = vpack.c.bf16 %v254_v47, %v252_v46 }
  0x3f   : > { %934 = vmatpush3.bf16.msra.mxu0 %v1057_v7  ;;  %1002 = vmatpush3.bf16.msra.mxu1 %v1057_v7  ;;  %v259_v51 = vld [vmem:[%s1248_s9 + $0x78] sm:$0xff]  ;;  %v273_v52 = vld [vmem:[%s1248_s9 + $0xe8] sm:$0xff]  ;;  %v288_v55 = vpack.c.bf16 %v270_v49, %v268_v48  ;;  %v256_v58 = vld [vmem:[%s1248_s9 + $0x60] sm:$0xff] }
  0x40   : > { %935 = vmatprep.subr.bf16.mxu0 %v1058_v8  ;;  %995 = vmatprep.subr.bf16.mxu1 %v1058_v8  ;;  %v275_v53 = vld [vmem:[%s1248_s9 + $0xf8] sm:$0xff]  ;;  %v283_v56 = vpack.c.bf16 %v259_v51, %v257_v50  ;;  %v258_v59 = vld [vmem:[%s1248_s9 + $0x70] sm:$0xff]  ;;  %v272_v60 = vld [vmem:[%s1248_s9 + $0xe0] sm:$0xff] }
  0x41   : > { %v291_v57 = vpack.c.bf16 %v275_v53, %v273_v52  ;;  %v274_v61 = vld [vmem:[%s1248_s9 + $0xf0] sm:$0xff]  ;;  %v282_v62 = vpack.c.bf16 %v258_v59, %v256_v58  ;;  %s1342_s9 = scalar_lea.vmem %s1499_s2, %s1336_s21 }
  0x42   : > { %v290_v63 = vpack.c.bf16 %v274_v61, %v272_v60 }
  0x43   : > { %936 = vmatpush3.bf16.msra.mxu0 %v1059_v9  ;;  %1003 = vmatpush3.bf16.msra.mxu1 %v1059_v9 }
  0x44   : > { %937 = vmatprep.subr.bf16.mxu0 %v1060_v10  ;;  %996 = vmatprep.subr.bf16.mxu1 %v1060_v10 }
  0x47   : > { %938 = vmatpush3.bf16.msra.mxu0 %v1061_v17  ;;  %1004 = vmatpush3.bf16.msra.mxu1 %v1061_v17 }
  0x48   : > { %939 = vmatprep.subr.bf16.mxu0 %v1062_v18  ;;  %997 = vmatprep.subr.bf16.mxu1 %v1062_v18 }
  0x4b   : > { %940 = vmatpush3.bf16.msra.mxu0 %v1063_v19  ;;  %1005 = vmatpush3.bf16.msra.mxu1 %v1063_v19 }
  0x4c   : > { %941 = vmatprep.subr.bf16.mxu0 %v1064_v20  ;;  %998 = vmatprep.subr.bf16.mxu1 %v1064_v20 }
  0x4f   : > { %942 = vmatpush3.bf16.msra.mxu0 %v1065_v21  ;;  %1006 = vmatpush3.bf16.msra.mxu1 %v1065_v21 }
  0x52   : > { %453 = vmatmul.mubr.bf16.vlgmr.msra.gmra.mrb[0].mxu0 %v276_v30  ;;  %485 = vmatmul.mubr.bf16.vlgmr.msra.gmra.mrb[0].mxu1 %v284_v31 }
  0x53   : > { %460 = vmatprep.mubr.bf16.mxu0 %v279_v32  ;;  %492 = vmatprep.mubr.bf16.mxu1 %v287_v33 }
  0x5a   : > { %461 = vmatmul.mubr.bf16.gmra.mrb[4].mxu0 %v278_v42  ;;  %493 = vmatmul.mubr.bf16.gmra.mrb[4].mxu1 %v286_v43 }
  0x5b   : > { %468 = vmatprep.mubr.bf16.mxu0 %v281_v44  ;;  %500 = vmatprep.mubr.bf16.mxu1 %v289_v45 }
  0x62   : > { %469 = vmatmul.mubr.bf16.gmra.mrb[8].mxu0 %v280_v54  ;;  %501 = vmatmul.mubr.bf16.gmra.mrb[8].mxu1 %v288_v55 }
  0x63   : > { %476 = vmatprep.mubr.bf16.mxu0 %v283_v56  ;;  %508 = vmatprep.mubr.bf16.mxu1 %v291_v57 }
  0x6a   : > { %477 = vmatmul.mubr.bf16.gmra.mrb[12].mxu0 %v282_v62  ;;  %509 = vmatmul.mubr.bf16.gmra.mrb[12].mxu1 %v290_v63 }
 0x125   : > { %v943_v0 = vpop.f32.mrb[0].mxu0  ;;  %v967_v1 = vpop.f32.mrb[0].mxu1 }
 0x126   : > { %v944_v2 = vpop.f32.mrb[1].mxu0  ;;  %v968_v3 = vpop.f32.mrb[1].mxu1 }
 0x127   : > { %v945_v4 = vadd.f32 %v944_v2, %v943_v0  ;;  %v969_v5 = vadd.f32 %v968_v3, %v967_v1  ;;  %v946_v6 = vpop.f32.mrb[2].mxu0  ;;  %v970_v7 = vpop.f32.mrb[2].mxu1 }
 0x128   : > { %v947_v8 = vpop.f32.mrb[3].mxu0  ;;  %v971_v9 = vpop.f32.mrb[3].mxu1 }
 0x129   : > { %v911_v10 = vpack.c.bf16 %v945_v4, %v945_v4  ;;  %v919_v11 = vpack.c.bf16 %v969_v5, %v969_v5  ;;  %v948_v12 = vadd.f32 %v947_v8, %v946_v6  ;;  %v972_v13 = vadd.f32 %v971_v9, %v970_v7 }
 0x12b   : > { %582 = vst.msk [vmem:[%s1342_s9] sm:$0xf] %vm581_vm0, %v911_v10  ;;  %590 = vst.msk [vmem:[%s1342_s9 + $0x20] sm:$0xf] %vm581_vm0, %v919_v11  ;;  %v912_v14 = vpack.c.bf16 %v948_v12, %v948_v12  ;;  %v920_v15 = vpack.c.bf16 %v972_v13, %v972_v13  ;;  %598 = vrot.lane.b32.xlu0 %v911_v10, %s1135_s19 }
 0x12d   : > { %583 = vst.msk [vmem:[%s1342_s9 + $0x4] sm:$0xf] %vm581_vm0, %v912_v14  ;;  %591 = vst.msk [vmem:[%s1342_s9 + $0x24] sm:$0xf] %vm581_vm0, %v920_v15  ;;  %616 = vrot.lane.b32.xlu1 %v920_v15, %s1135_s19  ;;  %v949_v16 = vpop.f32.mrb[4].mxu0  ;;  %v973_v17 = vpop.f32.mrb[4].mxu1 }
 0x12e   : > { %v950_v18 = vpop.f32.mrb[5].mxu0  ;;  %v974_v19 = vpop.f32.mrb[5].mxu1 }
 0x12f   : > { %614 = vrot.lane.b32.xlu0 %v919_v11, %s1135_s19  ;;  %v951_v20 = vadd.f32 %v950_v18, %v949_v16  ;;  %v952_v21 = vpop.f32.mrb[6].mxu0  ;;  %v975_v22 = vadd.f32 %v974_v19, %v973_v17  ;;  %v976_v23 = vpop.f32.mrb[6].mxu1 }
 0x130   : > { %v953_v24 = vpop.f32.mrb[7].mxu0  ;;  %v977_v25 = vpop.f32.mrb[7].mxu1 }
 0x131   : > { %v913_v26 = vpack.c.bf16 %v951_v20, %v951_v20  ;;  %664 = vrot.lane.b32.xlu1 %v912_v14, %s1136_s26  ;;  %v954_v27 = vadd.f32 %v953_v24, %v952_v21  ;;  %v921_v28 = vpack.c.bf16 %v975_v22, %v975_v22  ;;  %v978_v29 = vadd.f32 %v977_v25, %v976_v23 }
 0x133   : > { %584 = vst.msk [vmem:[%s1342_s9 + $0x8] sm:$0xf] %vm581_vm0, %v913_v26  ;;  %v914_v30 = vpack.c.bf16 %v954_v27, %v954_v27  ;;  %662 = vrot.lane.b32.xlu0 %v911_v10, %s1136_s26  ;;  %592 = vst.msk [vmem:[%s1342_s9 + $0x28] sm:$0xf] %vm581_vm0, %v921_v28  ;;  %v922_v31 = vpack.c.bf16 %v978_v29, %v978_v29 }
 0x135   : > { %585 = vst.msk [vmem:[%s1342_s9 + $0xc] sm:$0xf] %vm581_vm0, %v914_v30  ;;  %680 = vrot.lane.b32.xlu1 %v920_v15, %s1136_s26  ;;  %593 = vst.msk [vmem:[%s1342_s9 + $0x2c] sm:$0xf] %vm581_vm0, %v922_v31  ;;  %v955_v32 = vpop.f32.mrb[8].mxu0  ;;  %v979_v33 = vpop.f32.mrb[8].mxu1 }
 0x136   : > { %v956_v34 = vpop.f32.mrb[9].mxu0  ;;  %v980_v35 = vpop.f32.mrb[9].mxu1 }
 0x137   : > { %678 = vrot.lane.b32.xlu0 %v919_v11, %s1136_s26  ;;  %v957_v36 = vadd.f32 %v956_v34, %v955_v32  ;;  %v958_v37 = vpop.f32.mrb[10].mxu0  ;;  %v981_v38 = vadd.f32 %v980_v35, %v979_v33  ;;  %v982_v39 = vpop.f32.mrb[10].mxu1 }
 0x138   : > { %v959_v40 = vpop.f32.mrb[11].mxu0  ;;  %v983_v41 = vpop.f32.mrb[11].mxu1 }
 0x139   : > { %602 = vrot.lane.b32.xlu1 %v913_v26, %s1135_s19  ;;  %v915_v42 = vpack.c.bf16 %v957_v36, %v957_v36  ;;  %v960_v43 = vadd.f32 %v959_v40, %v958_v37  ;;  %v923_v44 = vpack.c.bf16 %v981_v38, %v981_v38  ;;  %v984_v45 = vadd.f32 %v983_v41, %v982_v39 }
 0x13b   : > { %600 = vrot.lane.b32.xlu0 %v912_v14, %s1135_s19  ;;  %586 = vst.msk [vmem:[%s1342_s9 + $0x10] sm:$0xf] %vm581_vm0, %v915_v42  ;;  %v916_v46 = vpack.c.bf16 %v960_v43, %v960_v43  ;;  %594 = vst.msk [vmem:[%s1342_s9 + $0x30] sm:$0xf] %vm581_vm0, %v923_v44  ;;  %v924_v47 = vpack.c.bf16 %v984_v45, %v984_v45 }
 0x13d   : > { %604 = vrot.lane.b32.xlu1 %v914_v30, %s1135_s19  ;;  %587 = vst.msk [vmem:[%s1342_s9 + $0x14] sm:$0xf] %vm581_vm0, %v916_v46  ;;  %595 = vst.msk [vmem:[%s1342_s9 + $0x34] sm:$0xf] %vm581_vm0, %v924_v47  ;;  %v961_v48 = vpop.f32.mrb[12].mxu0  ;;  %v985_v49 = vpop.f32.mrb[12].mxu1 }
 0x13e   : > { %v962_v50 = vpop.f32.mrb[13].mxu0  ;;  %v986_v51 = vpop.f32.mrb[13].mxu1 }
 0x13f   : > { %618 = vrot.lane.b32.xlu0 %v921_v28, %s1135_s19  ;;  %v963_v52 = vadd.f32 %v962_v50, %v961_v48  ;;  %v964_v53 = vpop.f32.mrb[14].mxu0  ;;  %v987_v54 = vadd.f32 %v986_v51, %v985_v49  ;;  %v988_v55 = vpop.f32.mrb[14].mxu1 }
 0x140   : > { %v965_v56 = vpop.f32.mrb[15].mxu0  ;;  %v989_v57 = vpop.f32.mrb[15].mxu1 }
 0x141   : > { %620 = vrot.lane.b32.xlu1 %v922_v31, %s1135_s19  ;;  %v917_v58 = vpack.c.bf16 %v963_v52, %v963_v52  ;;  %v966_v59 = vadd.f32 %v965_v56, %v964_v53  ;;  %v925_v60 = vpack.c.bf16 %v987_v54, %v987_v54  ;;  %v990_v61 = vadd.f32 %v989_v57, %v988_v55 }
 0x143   : > { %666 = vrot.lane.b32.xlu0 %v913_v26, %s1136_s26  ;;  %588 = vst.msk [vmem:[%s1342_s9 + $0x18] sm:$0xf] %vm581_vm0, %v917_v58  ;;  %v918_v62 = vpack.c.bf16 %v966_v59, %v966_v59  ;;  %596 = vst.msk [vmem:[%s1342_s9 + $0x38] sm:$0xf] %vm581_vm0, %v925_v60  ;;  %v926_v63 = vpack.c.bf16 %v990_v61, %v990_v61 }
 0x145   : > { %668 = vrot.lane.b32.xlu1 %v914_v30, %s1136_s26  ;;  %589 = vst.msk [vmem:[%s1342_s9 + $0x1c] sm:$0xf] %vm581_vm0, %v918_v62  ;;  %597 = vst.msk [vmem:[%s1342_s9 + $0x3c] sm:$0xf] %vm581_vm0, %v926_v63 }
 0x147   : > { %682 = vrot.lane.b32.xlu0 %v921_v28, %s1136_s26 }
 0x149   : > { %684 = vrot.lane.b32.xlu1 %v922_v31, %s1136_s26 }
 0x14b   : > { %606 = vrot.lane.b32.xlu0 %v915_v42, %s1135_s19 }
 0x14d   : > { %608 = vrot.lane.b32.xlu1 %v916_v46, %s1135_s19 }
 0x14f   : > { %622 = vrot.lane.b32.xlu0 %v923_v44, %s1135_s19 }
 0x151   : > { %624 = vrot.lane.b32.xlu1 %v924_v47, %s1135_s19 }
 0x153   : > { %670 = vrot.lane.b32.xlu0 %v915_v42, %s1136_s26 }
 0x155   : > { %672 = vrot.lane.b32.xlu1 %v916_v46, %s1136_s26 }
 0x157   : > { %686 = vrot.lane.b32.xlu0 %v923_v44, %s1136_s26 }
 0x159   : > { %688 = vrot.lane.b32.xlu1 %v924_v47, %s1136_s26 }
 0x15b   : > { %610 = vrot.lane.b32.xlu0 %v917_v58, %s1135_s19 }
 0x15d   : > { %612 = vrot.lane.b32.xlu1 %v918_v62, %s1135_s19 }
 0x15f   : > { %626 = vrot.lane.b32.xlu0 %v925_v60, %s1135_s19 }
 0x161   : > { %628 = vrot.lane.b32.xlu1 %v926_v63, %s1135_s19 }
 0x163   : > { %674 = vrot.lane.b32.xlu0 %v917_v58, %s1136_s26 }
 0x165   : > { %676 = vrot.lane.b32.xlu1 %v918_v62, %s1136_s26 }
 0x167   : > { %690 = vrot.lane.b32.xlu0 %v925_v60, %s1136_s26 }
 0x169   : > { %692 = vrot.lane.b32.xlu1 %v926_v63, %s1136_s26 }
 0x19d   : > { %v599_v0 = vpop.permute.xlu0 %598 }
 0x19e   : > { %646 = vst.msk [vmem:[%s1412_s29] sm:$0xf] %vm581_vm0, %v599_v0 }
 0x19f   : > { %v617_v1 = vpop.permute.xlu1 %616 }
 0x1a0   : > { %655 = vst.msk [vmem:[%s1412_s29 + $0x24] sm:$0xf] %vm581_vm0, %v617_v1 }
 0x1a1   : > { %v615_v2 = vpop.permute.xlu0 %614 }
 0x1a2   : > { %654 = vst.msk [vmem:[%s1412_s29 + $0x20] sm:$0xf] %vm581_vm0, %v615_v2 }
 0x1a3   : > { %v665_v3 = vpop.permute.xlu1 %664 }
 0x1a4   : > { %711 = vst.msk [vmem:[%s1422_s11 + $0x4] sm:$0xf] %vm581_vm0, %v665_v3 }
 0x1a5   : > { %v663_v4 = vpop.permute.xlu0 %662 }
 0x1a6   : > { %710 = vst.msk [vmem:[%s1422_s11] sm:$0xf] %vm581_vm0, %v663_v4 }
 0x1a7   : > { %v681_v5 = vpop.permute.xlu1 %680 }
 0x1a8   : > { %719 = vst.msk [vmem:[%s1422_s11 + $0x24] sm:$0xf] %vm581_vm0, %v681_v5 }
 0x1a9   : > { %v679_v6 = vpop.permute.xlu0 %678 }
 0x1aa   : > { %718 = vst.msk [vmem:[%s1422_s11 + $0x20] sm:$0xf] %vm581_vm0, %v679_v6 }
 0x1ab   : > { %v603_v7 = vpop.permute.xlu1 %602 }
 0x1ac   : > { %648 = vst.msk [vmem:[%s1412_s29 + $0x8] sm:$0xf] %vm581_vm0, %v603_v7 }
 0x1ad   : > { %v601_v8 = vpop.permute.xlu0 %600 }
 0x1ae   : > { %647 = vst.msk [vmem:[%s1412_s29 + $0x4] sm:$0xf] %vm581_vm0, %v601_v8 }
 0x1af   : > { %v605_v9 = vpop.permute.xlu1 %604 }
 0x1b0   : > { %649 = vst.msk [vmem:[%s1412_s29 + $0xc] sm:$0xf] %vm581_vm0, %v605_v9 }
 0x1b1   : > { %v619_v10 = vpop.permute.xlu0 %618 }
 0x1b2   : > { %656 = vst.msk [vmem:[%s1412_s29 + $0x28] sm:$0xf] %vm581_vm0, %v619_v10 }
 0x1b3   : > { %v621_v11 = vpop.permute.xlu1 %620 }
 0x1b4   : > { %657 = vst.msk [vmem:[%s1412_s29 + $0x2c] sm:$0xf] %vm581_vm0, %v621_v11 }
 0x1b5   : > { %v667_v12 = vpop.permute.xlu0 %666 }
 0x1b6   : > { %712 = vst.msk [vmem:[%s1422_s11 + $0x8] sm:$0xf] %vm581_vm0, %v667_v12 }
 0x1b7   : > { %v669_v13 = vpop.permute.xlu1 %668 }
 0x1b8   : > { %713 = vst.msk [vmem:[%s1422_s11 + $0xc] sm:$0xf] %vm581_vm0, %v669_v13 }
 0x1b9   : > { %v683_v14 = vpop.permute.xlu0 %682 }
 0x1ba   : > { %720 = vst.msk [vmem:[%s1422_s11 + $0x28] sm:$0xf] %vm581_vm0, %v683_v14 }
 0x1bb   : > { %v685_v15 = vpop.permute.xlu1 %684 }
 0x1bc   : > { %721 = vst.msk [vmem:[%s1422_s11 + $0x2c] sm:$0xf] %vm581_vm0, %v685_v15 }
 0x1bd   : > { %v607_v16 = vpop.permute.xlu0 %606 }
 0x1be   : > { %650 = vst.msk [vmem:[%s1412_s29 + $0x10] sm:$0xf] %vm581_vm0, %v607_v16 }
 0x1bf   : > { %v609_v17 = vpop.permute.xlu1 %608 }
 0x1c0   : > { %651 = vst.msk [vmem:[%s1412_s29 + $0x14] sm:$0xf] %vm581_vm0, %v609_v17 }
 0x1c1   : > { %v623_v18 = vpop.permute.xlu0 %622 }
 0x1c2   : > { %658 = vst.msk [vmem:[%s1412_s29 + $0x30] sm:$0xf] %vm581_vm0, %v623_v18 }
 0x1c3   : > { %v625_v19 = vpop.permute.xlu1 %624 }
 0x1c4   : > { %659 = vst.msk [vmem:[%s1412_s29 + $0x34] sm:$0xf] %vm581_vm0, %v625_v19 }
 0x1c5   : > { %v671_v20 = vpop.permute.xlu0 %670 }
 0x1c6   : > { %714 = vst.msk [vmem:[%s1422_s11 + $0x10] sm:$0xf] %vm581_vm0, %v671_v20 }
 0x1c7   : > { %v673_v21 = vpop.permute.xlu1 %672 }
 0x1c8   : > { %715 = vst.msk [vmem:[%s1422_s11 + $0x14] sm:$0xf] %vm581_vm0, %v673_v21 }
 0x1c9   : > { %v687_v22 = vpop.permute.xlu0 %686 }
 0x1ca   : > { %722 = vst.msk [vmem:[%s1422_s11 + $0x30] sm:$0xf] %vm581_vm0, %v687_v22 }
 0x1cb   : > { %v689_v23 = vpop.permute.xlu1 %688 }
 0x1cc   : > { %723 = vst.msk [vmem:[%s1422_s11 + $0x34] sm:$0xf] %vm581_vm0, %v689_v23 }
 0x1cd   : > { %v611_v24 = vpop.permute.xlu0 %610 }
 0x1ce   : > { %652 = vst.msk [vmem:[%s1412_s29 + $0x18] sm:$0xf] %vm581_vm0, %v611_v24 }
 0x1cf   : > { %v613_v25 = vpop.permute.xlu1 %612 }
 0x1d0   : > { %653 = vst.msk [vmem:[%s1412_s29 + $0x1c] sm:$0xf] %vm581_vm0, %v613_v25 }
 0x1d1   : > { %v627_v26 = vpop.permute.xlu0 %626 }
 0x1d2   : > { %660 = vst.msk [vmem:[%s1412_s29 + $0x38] sm:$0xf] %vm581_vm0, %v627_v26 }
 0x1d3   : > { %v629_v27 = vpop.permute.xlu1 %628 }
 0x1d4   : > { %661 = vst.msk [vmem:[%s1412_s29 + $0x3c] sm:$0xf] %vm581_vm0, %v629_v27 }
 0x1d5   : > { %v675_v28 = vpop.permute.xlu0 %674 }
 0x1d6   : > { %716 = vst.msk [vmem:[%s1422_s11 + $0x18] sm:$0xf] %vm581_vm0, %v675_v28 }
 0x1d7   : > { %v677_v29 = vpop.permute.xlu1 %676 }
 0x1d8   : > { %717 = vst.msk [vmem:[%s1422_s11 + $0x1c] sm:$0xf] %vm581_vm0, %v677_v29 }
 0x1d9   : > { %v691_v30 = vpop.permute.xlu0 %690 }
 0x1da   : > { %724 = vst.msk [vmem:[%s1422_s11 + $0x38] sm:$0xf] %vm581_vm0, %v691_v30 }
 0x1db   : > { %v693_v31 = vpop.permute.xlu1 %692 }
 0x1dc   : > { %725 = vst.msk [vmem:[%s1422_s11 + $0x3c] sm:$0xf] %vm581_vm0, %v693_v31 }
 0x1dd PF: > { %p15_p8 = scmp.ge.s32.totalorder %s1184_s20, 4   ;;  %s1505_s15 = smov %s1122_s16 }
 0x1de   : > { %s1506_s16 = smov %s1126_s17  ;;  %s1507_s17 = smov %s1194_s23 }
 0x1df   : > { %s1508_s18 = smov %s1184_s20  ;;  %17 = sbr.rel (!%p15_p8) target bundleno = 3 (0x3), region = 92 }
 0x1e6   :  { %779 = vsyncpa [#allocation3], 1 }
 0x1e7   :  { %781 = vsyncpa [#allocation3 + $0x1], 1 }

</bundles_post_ra>
